<compile_context>
chip_gen: v7x
topology: tpu7x:2x2x1
jax: 0.10.0
libtpu: 0.0.40
codegen_flags: <defaults>
</compile_context>

<pallas_src>
import functools

import numpy as np
import jax
import jax.numpy as jnp
from jax.experimental import pallas as pl
from jax.experimental.pallas import tpu as pltpu


_VMEM_LIMIT_BYTES = 48 * 1024 * 1024   # scoped VMEM limit (safe on v5e/v6e/v7x)
_VMEM_BUDGET_BYTES = 40 * 1024 * 1024  # target double-buffered working set


def _round_up(x, m):
    return ((x + m - 1) // m) * m


def _signed_perm_matrix(perm, signs, dtype):
    """Matrix M such that (x.reshape(N, J*C) @ M) == mirrored x.

    out[:, j*C + c] = signs[c] * x[:, perm[j]*C + c]
    """
    J = len(perm)
    C = len(signs)
    M = np.zeros((J * C, J * C), dtype=np.float32)
    for j, pj in enumerate(perm):
        for c, s in enumerate(signs):
            M[pj * C + c, j * C + c] = s
    return jnp.asarray(M, dtype=dtype)


def _choose_tile(n, lane_bytes_per_frame, max_tile, min_steps):
    """Frame-tile size: multiple of 8, VMEM-budgeted, >= min_steps grid steps."""
    # in + out streams, double-buffered.
    bytes_per_frame = 2 * 2 * lane_bytes_per_frame
    cap_vmem = max(8, (_VMEM_BUDGET_BYTES // bytes_per_frame) // 8 * 8)
    want = _round_up(-(-n // min_steps), 8)      # split frame axis across cores
    return max(8, min(int(max_tile), int(cap_vmem), int(want)))


def _mirror_kernel(pos_ref, rot_ref, mpos_ref, mrot_ref, pos_out_ref, rot_out_ref):
    # One MXU matmul per tensor does joint swap + sign flip in a single op.
    # HIGHEST precision keeps the +/-1 permutation bit-exact for f32 inputs;
    # the extra MXU passes ride in the otherwise-idle vex slot (mem-bound op).
    pos_out_ref[...] = jnp.dot(
        pos_ref[...], mpos_ref[...],
        preferred_element_type=jnp.float32,
        precision=jax.lax.Precision.HIGHEST,
    ).astype(pos_out_ref.dtype)
    rot_out_ref[...] = jnp.dot(
        rot_ref[...], mrot_ref[...],
        preferred_element_type=jnp.float32,
        precision=jax.lax.Precision.HIGHEST,
    ).astype(rot_out_ref.dtype)


@functools.partial(
    jax.jit,
    static_argnames=("bone_pair_indices", "max_tile", "min_steps", "alias_inputs"))
def mirror_pallas(positions, rotations, bone_pair_indices, *,
                  max_tile=4096, min_steps=4, alias_inputs=False):
    """positions: (N, J, 3), rotations: (N, J, 4) -> mirrored (same shapes)."""
    perm = tuple(int(i) for i in bone_pair_indices)
    N, J, Cp = positions.shape
    _, _, Cr = rotations.shape

    # Lane-dense 2D layout (free bitcast reshape for contiguous inputs).
    pos2d = positions.reshape(N, J * Cp)
    rot2d = rotations.reshape(N, J * Cr)

    itemsize = jnp.dtype(positions.dtype).itemsize
    lane_bytes = (_round_up(J * Cp, 128) + _round_up(J * Cr, 128)) * itemsize
    TN = _choose_tile(N, lane_bytes, max_tile, min_steps)
    grid = -(-N // TN)   # ragged last block handled by Pallas: no pad, no slice

    # reflection_matrix = diag(-1, 1, 1); quat_indices = [2, 3].
    m_pos = _signed_perm_matrix(perm, (-1.0, 1.0, 1.0), positions.dtype)
    m_rot = _signed_perm_matrix(perm, (1.0, 1.0, -1.0, -1.0), rotations.dtype)

    flops = 2 * N * ((J * Cp) ** 2 + (J * Cr) ** 2)
    bytes_accessed = 2 * N * (J * Cp + J * Cr) * itemsize

    out_pos, out_rot = pl.pallas_call(
        _mirror_kernel,
        out_shape=(
            jax.ShapeDtypeStruct((N, J * Cp), positions.dtype),
            jax.ShapeDtypeStruct((N, J * Cr), rotations.dtype),
        ),
        grid=(grid,),
        in_specs=[
            pl.BlockSpec((TN, J * Cp), lambda i: (i, 0)),
            pl.BlockSpec((TN, J * Cr), lambda i: (i, 0)),
            pl.BlockSpec((J * Cp, J * Cp), lambda i: (0, 0)),
            pl.BlockSpec((J * Cr, J * Cr), lambda i: (0, 0)),
        ],
        out_specs=(
            pl.BlockSpec((TN, J * Cp), lambda i: (i, 0)),
            pl.BlockSpec((TN, J * Cr), lambda i: (i, 0)),
        ),
        compiler_params=pltpu.CompilerParams(
            dimension_semantics=("parallel",),
            vmem_limit_bytes=_VMEM_LIMIT_BYTES),
        cost_estimate=pl.CostEstimate(
            flops=flops, transcendentals=0, bytes_accessed=bytes_accessed),
        # In-place only when the caller actually donates (otherwise XLA would
        # insert a defensive copy, re-adding an HBM pass).
        input_output_aliases=({0: 0, 1: 1} if alias_inputs else {}),
    )(pos2d, rot2d, m_pos, m_rot)

    return out_pos.reshape(N, J, Cp), out_rot.reshape(N, J, Cr)


class BatchMirrorPallas:
    """JAX/Pallas equivalent of BatchMirror (stochastic Mirror over a batch)."""

    def __init__(self, bone_pair_indices, nb_joints, mirror_prob=0.5):
        self.bone_pair_indices = tuple(int(i) for i in bone_pair_indices)
        self.nb_joints = int(nb_joints)
        self.mirror_prob = float(mirror_prob)

    def __call__(self, batch, key):
        pos = batch['joint_positions']   # (B, T, J, 3)
        rot = batch['joint_rotations']   # (B, T, J, 4)
        J = self.nb_joints

        def mirror_fn(args):
            p, r = args
            mp, mr = mirror_pallas(p.reshape(-1, J, 3),
                                   r.reshape(-1, J, 4),
                                   self.bone_pair_indices)
            return mp.reshape(p.shape), mr.reshape(r.shape)

        def identity_fn(args):
            return args

        # torch.rand(1)[0] < mirror_probability -> stochastic mirror decision.
        # lax.cond skips the kernel entirely when no mirroring is applied.
        do_mirror = jax.random.uniform(key, ()) < self.mirror_prob
        new_pos, new_rot = jax.lax.cond(do_mirror, mirror_fn, identity_fn,
                                        (pos, rot))

        out = dict(batch)
        out['joint_positions'] = new_pos
        out['joint_rotations'] = new_rot
        return out


def _mirror_ref(pos, rot, perm):
    """Pure-JAX reference of Mirror.forward for correctness checking."""
    perm = jnp.asarray(perm)
    refl = jnp.asarray([-1.0, 1.0, 1.0], pos.dtype)
    qsgn = jnp.asarray([1.0, 1.0, -1.0, -1.0], rot.dtype)
    return pos[:, perm, :] * refl, rot[:, perm, :] * qsgn


if __name__ == "__main__":
    key = jax.random.PRNGKey(0)
    k_pos, k_rot, k_decide = jax.random.split(key, 3)

    # Small synthetic skeleton: 4 joints, left/right bone pairs swapped.
    B, T, J = 2, 8, 4
    bone_pair_indices = (1, 0, 3, 2)

    pos = jax.random.normal(k_pos, (B, T, J, 3), dtype=jnp.float32)
    rot = jax.random.normal(k_rot, (B, T, J, 4), dtype=jnp.float32)
    rot = rot / jnp.linalg.norm(rot, axis=-1, keepdims=True)

    # Validate the kernel against the pure-JAX reference (multi-step grid).
    m_pos, m_rot = mirror_pallas(pos.reshape(-1, J, 3),
                                 rot.reshape(-1, J, 4),
                                 bone_pair_indices)
    r_pos, r_rot = _mirror_ref(pos.reshape(-1, J, 3),
                               rot.reshape(-1, J, 4),
                               bone_pair_indices)
    assert jnp.allclose(m_pos, r_pos, atol=1e-6), "position mirror mismatch"
    assert jnp.allclose(m_rot, r_rot, atol=1e-6), "rotation mirror mismatch"

    # Frame count not a multiple of the tile / of 8: exercises the ragged last
    # block (no padding, no trailing slice).
    pos_odd = pos[:, :5].reshape(-1, J, 3)   # N = 10
    rot_odd = rot[:, :5].reshape(-1, J, 4)
    m_pos2, m_rot2 = mirror_pallas(pos_odd, rot_odd, bone_pair_indices)
    r_pos2, r_rot2 = _mirror_ref(pos_odd, rot_odd, bone_pair_indices)
    assert jnp.allclose(m_pos2, r_pos2, atol=1e-6), "ragged position mismatch"
    assert jnp.allclose(m_rot2, r_rot2, atol=1e-6), "ragged rotation mismatch"

    # Exercise the in-place (aliased) path as well.
    m_pos3, m_rot3 = mirror_pallas(pos.reshape(-1, J, 3),
                                   rot.reshape(-1, J, 4),
                                   bone_pair_indices, alias_inputs=True)
    assert jnp.allclose(m_pos3, r_pos, atol=1e-6), "aliased position mismatch"
    assert jnp.allclose(m_rot3, r_rot, atol=1e-6), "aliased rotation mismatch"

    # Full BatchMirror forward (stochastic branch via lax.cond).
    batch = {'joint_positions': pos, 'joint_rotations': rot}
    mirror_module = BatchMirrorPallas(bone_pair_indices, J, mirror_prob=0.5)
    out = mirror_module(batch, k_decide)

    jax.block_until_ready(out['joint_positions'])
    jax.block_until_ready(out['joint_rotations'])
    print("KERNEL_OK")
</pallas_src>

<mosaic_0001>
module attributes {stable_mosaic.version = 11 : i64} {
  func.func @_mirror_kernel(%arg0: i32, %arg1: memref<8x12xf32, #tpu.memory_space<vmem>>, %arg2: memref<8x16xf32, #tpu.memory_space<vmem>>, %arg3: memref<12x12xf32, #tpu.memory_space<vmem>>, %arg4: memref<16x16xf32, #tpu.memory_space<vmem>>, %arg5: memref<8x12xf32, #tpu.memory_space<vmem>>, %arg6: memref<8x16xf32, #tpu.memory_space<vmem>>) attributes {dimension_semantics = [#tpu.dimension_semantics<parallel>], iteration_bounds = array<i64: 2>, scalar_prefetch = 0 : i64, scratch_operands = 0 : i64, tpu.core_type = #tpu.core_type<tc>, window_params = [{transform_indices = @transform_0, window_bounds = array<i64: 8, 12>}, {transform_indices = @transform_1, window_bounds = array<i64: 8, 16>}, {pipeline_mode = #tpu.pipeline_mode<synchronous>, transform_indices = @transform_2, window_bounds = array<i64: 12, 12>}, {pipeline_mode = #tpu.pipeline_mode<synchronous>, transform_indices = @transform_3, window_bounds = array<i64: 16, 16>}, {transform_indices = @transform_4, window_bounds = array<i64: 8, 12>}, {transform_indices = @transform_5, window_bounds = array<i64: 8, 16>}]} {
    %c0 = arith.constant 0 : index
    %c0_0 = arith.constant 0 : index
    %0 = vector.load %arg1[%c0, %c0_0] : memref<8x12xf32, #tpu.memory_space<vmem>>, vector<8x12xf32>
    %c0_1 = arith.constant 0 : index
    %c0_2 = arith.constant 0 : index
    %1 = vector.load %arg3[%c0_1, %c0_2] : memref<12x12xf32, #tpu.memory_space<vmem>>, vector<12x12xf32>
    %cst = arith.constant dense<0.000000e+00> : vector<8x12xf32>
    %2 = tpu.matmul %0, %1, %cst {dimension_numbers = #tpu.dot_dimension_numbers<[1], [0], [0], [1], [0, 0, 1, 1], [], []>, precision = #tpu.contract_precision<fp32>} : vector<8x12xf32>, vector<12x12xf32>, vector<8x12xf32> -> vector<8x12xf32>
    %c0_3 = arith.constant 0 : index
    %c0_4 = arith.constant 0 : index
    %3 = vector.load %arg5[%c0_3, %c0_4] : memref<8x12xf32, #tpu.memory_space<vmem>>, vector<8x12xf32>
    tpu.vector_store %arg5[%c0_3, %c0_4], %2 {strides = array<i32>} : memref<8x12xf32, #tpu.memory_space<vmem>>, vector<8x12xf32>,
    %c0_5 = arith.constant 0 : index
    %c0_6 = arith.constant 0 : index
    %4 = vector.load %arg2[%c0_5, %c0_6] : memref<8x16xf32, #tpu.memory_space<vmem>>, vector<8x16xf32>
    %c0_7 = arith.constant 0 : index
    %c0_8 = arith.constant 0 : index
    %5 = vector.load %arg4[%c0_7, %c0_8] : memref<16x16xf32, #tpu.memory_space<vmem>>, vector<16x16xf32>
    %cst_9 = arith.constant dense<0.000000e+00> : vector<8x16xf32>
    %6 = tpu.matmul %4, %5, %cst_9 {dimension_numbers = #tpu.dot_dimension_numbers<[1], [0], [0], [1], [0, 0, 1, 1], [], []>, precision = #tpu.contract_precision<fp32>} : vector<8x16xf32>, vector<16x16xf32>, vector<8x16xf32> -> vector<8x16xf32>
    %c0_10 = arith.constant 0 : index
    %c0_11 = arith.constant 0 : index
    %7 = vector.load %arg6[%c0_10, %c0_11] : memref<8x16xf32, #tpu.memory_space<vmem>>, vector<8x16xf32>
    tpu.vector_store %arg6[%c0_10, %c0_11], %6 {strides = array<i32>} : memref<8x16xf32, #tpu.memory_space<vmem>>, vector<8x16xf32>,
    return
  }
  func.func @transform_0(%arg0: i32) -> (i32, i32) {
    %c0_i32 = arith.constant 0 : i32
    %c0_i32_0 = arith.constant 0 : i32
    return %arg0, %c0_i32 : i32, i32
  }
  func.func @transform_1(%arg0: i32) -> (i32, i32) {
    %c0_i32 = arith.constant 0 : i32
    %c0_i32_0 = arith.constant 0 : i32
    return %arg0, %c0_i32 : i32, i32
  }
  func.func @transform_2(%arg0: i32) -> (i32, i32) {
    %c0_i32 = arith.constant 0 : i32
    %c0_i32_0 = arith.constant 0 : i32
    %c0_i32_1 = arith.constant 0 : i32
    return %c0_i32, %c0_i32_0 : i32, i32
  }
  func.func @transform_3(%arg0: i32) -> (i32, i32) {
    %c0_i32 = arith.constant 0 : i32
    %c0_i32_0 = arith.constant 0 : i32
    %c0_i32_1 = arith.constant 0 : i32
    return %c0_i32, %c0_i32_0 : i32, i32
  }
  func.func @transform_4(%arg0: i32) -> (i32, i32) {
    %c0_i32 = arith.constant 0 : i32
    %c0_i32_0 = arith.constant 0 : i32
    return %arg0, %c0_i32 : i32, i32
  }
  func.func @transform_5(%arg0: i32) -> (i32, i32) {
    %c0_i32 = arith.constant 0 : i32
    %c0_i32_0 = arith.constant 0 : i32
    return %arg0, %c0_i32 : i32, i32
  }
}

</mosaic_0001>

<bundles_post_ra>
// kernel: mirror_pallas.1
= control target key start
LH: loop header
LB: loop body
LE: loop exit
PB: predicated region body
PF: predicated region fallthrough
CT: control target
= control target key end

     0   :  { %s1521_s18 = smov 0   ;;  %s1632_s0 = inlined_call_operand.vmem [shape: f32[16,12], index: 0, kind: input, shape index: {}]   ;;  %s1633_s1 = inlined_call_operand.vmem [shape: f32[16,16], index: 1, kind: input, shape index: {}]   ;;  %s1634_s2 = inlined_call_operand.vmem [shape: f32[12,12], index: 2, kind: input, shape index: {}]   ;;  %s1635_s3 = inlined_call_operand.vmem [shape: f32[16,16], index: 3, kind: input, shape index: {}]   ;;  %s1636_s4 = inlined_call_operand.vmem [shape: f32[16,12], index: 4, kind: output, shape index: {0}]   ;;  %s1637_s5 = inlined_call_operand.vmem [shape: f32[16,16], index: 5, kind: output, shape index: {1}]  }
   0x1 LB: > { %s1282_s19 = sadd.s32 4294967295, %s1486_s18   ;;  %p1286_p0 = scmp.ge.s32.totalorder %s1486_s18, 1  ;;  %s1486_s18 = sphi %s1521_s18, %s16_s18  }
   0x2   : > { %p198_p1 = scmp.lt.s32.totalorder %s1486_s18, 3 }
   0x4   : > { %p199_p2 = pnand %p1286_p0, %p198_p1 }
   0x5   : > { %v249_v0 = vld [vmem:[%s1634_s2] sm:$0xff] (!%p199_p2)  ;;  %v250_v1 = vld [vmem:[%s1634_s2 + $0x8] sm:$0xf] (!%p199_p2)  ;;  %vm255_vm0 = vcmask (!%p199_p2), 1043456   ;;  %v1488_v3 = vmov (!%p199_p2), 0.0|0.0   ;;  %p232_p3 = scmp.lt.s32.totalorder (!%p199_p2), %s1282_s19, 1 }
   0x6   : > { %202 = sbr.rel (%p199_p2) target bundleno = 282 (0x11a), region = 36  ;;  %v720_v2 = vld [vmem:[%s1635_s3] sm:$0xff] (!%p199_p2)  ;;  %1413 = vmatprep.subr.bf16.mxu0 (!%p199_p2), %v1488_v3  ;;  %1431 = vmatprep.subr.bf16.mxu1 (!%p199_p2), %v1488_v3  ;;  %v257_v4 = vsel (!%p199_p2), %vm255_vm0, %v250_v1, 0  ;;  %v260_v5 = vand.u32 (!%p199_p2), 4294901760, %v249_v0  ;;  %v721_v6 = vld [vmem:[%s1635_s3 + $0x8] sm:$0xff] (!%p199_p2)  ;;  %vm1489_vm1 = vmmov (!%p199_p2), 0  }
   0x7   : > { %v727_v7 = vand.u32 (!%p199_p2), 4294901760, %v720_v2  ;;  %v263_v8 = vand.u32 (!%p199_p2), 4294901760, %v257_v4  ;;  %v730_v9 = vand.u32 (!%p199_p2), 4294901760, %v721_v6  ;;  %v1490_v12 = vmov (!%p199_p2), 0.0  }
   0x8   : > { %v1543_v10 = vsub.f32 (!%p199_p2), %v249_v0, %v260_v5  ;;  %1333 = vmatprep.mubr.msk.f32.mxu0 (!%p199_p2), %vm1489_vm1, %v1490_v12  ;;  %1375 = vmatprep.mubr.msk.f32.mxu1 (!%p199_p2), %vm1489_vm1, %v1490_v12  ;;  %vm251_vm2 = vcmask (!%p199_p2), 97280   ;;  %vm722_vm3 = vcmask (!%p199_p2), 130048  }
   0x9   : > { %v1545_v11 = vsub.f32 (!%p199_p2), %v720_v2, %v727_v7  ;;  %v1551_v13 = vpack.c.bf16 (!%p199_p2), %v263_v8, %v260_v5  ;;  %v1553_v14 = vsub.f32 (!%p199_p2), %v257_v4, %v263_v8  ;;  %v1555_v15 = vpack.c.bf16 (!%p199_p2), %v730_v9, %v727_v7 }
   0xa   : > { %v1557_v16 = vsub.f32 (!%p199_p2), %v721_v6, %v730_v9  ;;  %v339_v17 = vand.u32 (!%p199_p2), 4294901760, %v1543_v10 }
   0xb   : > { %v806_v18 = vand.u32 (!%p199_p2), 4294901760, %v1545_v11  ;;  %1415 = vmatpush3.bf16.msra.mxu0 (!%p199_p2), %v1551_v13  ;;  %1433 = vmatpush3.bf16.msra.mxu1 (!%p199_p2), %v1555_v15  ;;  %v346_v19 = vand.u32 (!%p199_p2), 4294901760, %v1553_v14  ;;  %v1420_v45 = vpack.c.bf16 (!%p199_p2), %v1553_v14, %v1543_v10 }
   0xc   : > { %v813_v20 = vand.u32 (!%p199_p2), 4294901760, %v1557_v16  ;;  %1416 = vmatprep.subr.bf16.mxu0 (!%p199_p2), %v1488_v3  ;;  %1434 = vmatprep.subr.bf16.mxu1 (!%p199_p2), %v1488_v3  ;;  %v340_v22 = vsub.f32 (!%p199_p2), %v1543_v10, %v339_v17  ;;  %v1438_v46 = vpack.c.bf16 (!%p199_p2), %v1557_v16, %v1545_v11 }
   0xd   : > { %s1639_s19 = smov (!%p232_p3, %s1282_s19), 1  ;;  %v807_v24 = vsub.f32 %v1545_v11, %v806_v18  ;;  %v347_v26 = vsub.f32 %v1553_v14, %v346_v19  ;;  %v1426_v47 = vpack.c.bf16 %v346_v19, %v339_v17 }
   0xe   : > { %s1559_s28 = sshll.u32 %s1639_s19, 3  ;;  %v814_v28 = vsub.f32 %v1557_v16, %v813_v20  ;;  %v341_v33 = vand.u32 4294901760, %v340_v22  ;;  %v1444_v48 = vpack.c.bf16 %v813_v20, %v806_v18 }
   0xf   : > { %s235_s6 = scalar_lea.vmem %s1632_s0, %s1559_s28  ;;  %s239_s9 = scalar_lea.vmem %s1633_s1, %s1559_s28  ;;  %v348_v34 = vand.u32 4294901760, %v347_v26  ;;  %v808_v35 = vand.u32 4294901760, %v807_v24 }
  0x10   : > { %v248_v21 = vld [vmem:[%s235_s6] sm:$0xff]  ;;  %v815_v36 = vand.u32 4294901760, %v814_v28  ;;  %s243_s12 = scalar_lea.vmem %s1636_s4, %s1559_s28  ;;  %s247_s15 = scalar_lea.vmem %s1637_s5, %s1559_s28 }
  0x11   : > { %v719_v23 = vld [vmem:[%s239_s9] sm:$0xff]  ;;  %v253_v25 = vsel %vm251_vm2, %v248_v21, 0  ;;  %v1417_v41 = vpack.c.bf16 %v348_v34, %v341_v33 }
  0x12   : > { %v724_v27 = vsel %vm722_vm3, %v719_v23, 0  ;;  %v326_v29 = vand.u32 4294901760, %v253_v25  ;;  %v1435_v42 = vpack.c.bf16 %v815_v36, %v808_v35 }
  0x13   : > { %v793_v30 = vand.u32 4294901760, %v724_v27 }
  0x14   : > { %v327_v31 = vsub.f32 %v253_v25, %v326_v29 }
  0x15   : > { %v794_v32 = vsub.f32 %v724_v27, %v793_v30 }
  0x16   : > { %v328_v37 = vand.u32 4294901760, %v327_v31 }
  0x17   : > { %v795_v38 = vand.u32 4294901760, %v794_v32 }
  0x18   : > { %v329_v39 = vsub.f32 %v327_v31, %v328_v37 }
  0x19   : > { %v796_v40 = vsub.f32 %v794_v32, %v795_v38 }
  0x1a   : > { %v330_v43 = vand.u32 4294901760, %v329_v39 }
  0x1b   : > { %v797_v44 = vand.u32 4294901760, %v796_v40 }
  0x1c   : > { %1334 = vmatmul.mubr.f32.vlgmr.msra.gmra.mrb[0].mxu0 %v330_v43 }
  0x1d   : > { %1376 = vmatmul.mubr.f32.vlgmr.msra.gmra.mrb[0].mxu1 %v797_v44  ;;  %1418 = vmatpush3.bf16.msra.mxu0 %v1417_v41 }
  0x1e   : > { %1436 = vmatpush3.bf16.msra.mxu1 %v1435_v42  ;;  %1340 = vmatprep.mubr.msk.f32.mxu0 %vm1489_vm1, %v1490_v12 }
  0x1f   : > { %1419 = vmatprep.subr.bf16.mxu0 %v1488_v3  ;;  %1382 = vmatprep.mubr.msk.f32.mxu1 %vm1489_vm1, %v1490_v12 }
  0x20   : > { %1437 = vmatprep.subr.bf16.mxu1 %v1488_v3 }
  0x24   : > { %1341 = vmatmul.mubr.f32.vlgmr.msra.gmra.mrb[0].mxu0 %v326_v29 }
  0x25   : > { %1383 = vmatmul.mubr.f32.vlgmr.msra.gmra.mrb[0].mxu1 %v793_v30  ;;  %1421 = vmatpush3.bf16.msra.mxu0 %v1420_v45 }
  0x26   : > { %1439 = vmatpush3.bf16.msra.mxu1 %v1438_v46  ;;  %1347 = vmatprep.mubr.msk.f32.mxu0 %vm1489_vm1, %v1490_v12 }
  0x27   : > { %1422 = vmatprep.subr.bf16.mxu0 %v1488_v3  ;;  %1389 = vmatprep.mubr.msk.f32.mxu1 %vm1489_vm1, %v1490_v12 }
  0x28   : > { %1440 = vmatprep.subr.bf16.mxu1 %v1488_v3 }
  0x2c   : > { %1348 = vmatmul.mubr.f32.vlgmr.msra.gmra.mrb[0].mxu0 %v327_v31 }
  0x2d   : > { %1390 = vmatmul.mubr.f32.vlgmr.msra.gmra.mrb[0].mxu1 %v794_v32  ;;  %1424 = vmatpush3.bf16.msra.mxu0 %v1551_v13 }
  0x2e   : > { %1442 = vmatpush3.bf16.msra.mxu1 %v1555_v15  ;;  %1354 = vmatprep.mubr.msk.f32.mxu0 %vm1489_vm1, %v1490_v12 }
  0x2f   : > { %1425 = vmatprep.subr.bf16.mxu0 %v1488_v3  ;;  %1396 = vmatprep.mubr.msk.f32.mxu1 %vm1489_vm1, %v1490_v12 }
  0x30   : > { %1443 = vmatprep.subr.bf16.mxu1 %v1488_v3 }
  0x34   : > { %1355 = vmatmul.mubr.f32.vlgmr.msra.gmra.mrb[0].mxu0 %v328_v37 }
  0x35   : > { %1397 = vmatmul.mubr.f32.vlgmr.msra.gmra.mrb[0].mxu1 %v795_v38  ;;  %1427 = vmatpush3.bf16.msra.mxu0 %v1426_v47 }
  0x36   : > { %1445 = vmatpush3.bf16.msra.mxu1 %v1444_v48  ;;  %1361 = vmatprep.mubr.msk.f32.mxu0 %vm1489_vm1, %v1490_v12 }
  0x37   : > { %1428 = vmatprep.subr.bf16.mxu0 %v1488_v3  ;;  %1403 = vmatprep.mubr.msk.f32.mxu1 %vm1489_vm1, %v1490_v12 }
  0x38   : > { %1446 = vmatprep.subr.bf16.mxu1 %v1488_v3 }
  0x3c   : > { %1362 = vmatmul.mubr.f32.vlgmr.msra.gmra.mrb[0].mxu0 %v326_v29 }
  0x3d   : > { %1404 = vmatmul.mubr.f32.vlgmr.msra.gmra.mrb[0].mxu1 %v793_v30  ;;  %1430 = vmatpush3.bf16.msra.mxu0 %v1551_v13 }
  0x3e   : > { %1448 = vmatpush3.bf16.msra.mxu1 %v1555_v15  ;;  %1368 = vmatprep.mubr.msk.f32.mxu0 %vm1489_vm1, %v1490_v12 }
  0x3f   : > { %1410 = vmatprep.mubr.msk.f32.mxu1 %vm1489_vm1, %v1490_v12 }
  0x44   : > { %1369 = vmatmul.mubr.f32.vlgmr.msra.gmra.mrb[0].mxu0 %v326_v29 }
  0x45   : > { %1411 = vmatmul.mubr.f32.vlgmr.msra.gmra.mrb[0].mxu1 %v793_v30 }
 0x117   : > { %v714_v49 = vpop.f32.mrb[0].mxu0 }
 0x118   : > { %v1181_v50 = vpop.f32.mrb[0].mxu1  ;;  %718 = vst.msk [vmem:[%s243_s12] sm:$0xff] %vm251_vm2, %v714_v49  ;;  %v1370_v51 = vpop.f32.mrb[1].mxu0 }
 0x119   : > { %1185 = vst.msk [vmem:[%s247_s15] sm:$0xff] %vm722_vm3, %v1181_v50  ;;  %v1412_v52 = vpop.f32.mrb[1].mxu1 }
 0x11a PF: > { %s16_s18 = sadd.s32 1, %s1486_s18  }
 0x11b   : > { %p13_p4 = scmp.ge.s32.totalorder %s16_s18, 4  }
 0x11d   :  { %15 = sbr.rel (!%p13_p4) target bundleno = 1 (0x1), region = 81 }

</bundles_post_ra>
